<compile_context>
chip_gen: v7x
topology: tpu7x:2x2x1
jax: 0.10.0
libtpu: 0.0.40
codegen_flags: <defaults>
</compile_context>

<pallas_src>
import functools

import jax
import jax.numpy as jnp
from jax import lax
from jax.experimental import pallas as pl
from jax.experimental.pallas import tpu as pltpu


def _cdiv(a, b):
    return (a + b - 1) // b


def _round_up(a, b):
    return _cdiv(a, b) * b


def _cwl2_kernel(y_ref, w_ref, xorig_ref, logits_ref, out_ref, acc_ref, *,
                 box_transform, c, kappa, n_valid, num_tiles, tile_rows, lanes):
    p = pl.program_id(0)                 # parallel slab slice (megacore on v7x)
    k = pl.program_id(1)                 # reduction step along the feature stream

    # ---- init accumulator at the start of each reduction sweep ----
    @pl.when(k == 0)
    def _():
        acc_ref[...] = jnp.zeros_like(acc_ref)

    # ---- streamed squared-L2 partial: acc += (box(w) - x_orig)^2 ----
    wv = w_ref[...].astype(jnp.float32)          # upcast in-kernel (streams stay native dtype)
    xv = xorig_ref[...].astype(jnp.float32)
    diff = box_transform(wv) - xv                # tanh -> EUP slot (free vs mem-bound stream)

    # Mask out the zero-padded tail exactly (independent of box_transform / dtype).
    row_base = (p * num_tiles + k) * tile_rows
    rows = lax.broadcasted_iota(jnp.int32, (tile_rows, lanes), 0)
    cols = lax.broadcasted_iota(jnp.int32, (tile_rows, lanes), 1)
    gidx = (row_base + rows) * lanes + cols
    diff = jnp.where(gidx < n_valid, diff, 0.0)

    acc_ref[...] += diff * diff                  # pure VPU; no per-step cross-lane reduce

    # ---- finalize: reduce partial norm, add C&W f term, write output ----
    @pl.when(k == pl.num_programs(1) - 1)
    def _():
        partial_norm = jnp.sum(acc_ref[...])                         # scalar (XLU, once per p)

        logits = logits_ref[...].astype(jnp.float32)                 # (B, K), resident
        max_all = jnp.max(logits)       # global max == torch's logits[all-ones-mask].max()
        y = y_ref[0]                    # target class index (SMEM scalar)
        col_ids = lax.broadcasted_iota(jnp.int32, logits.shape, 1)
        target_val = jnp.sum(jnp.where(col_ids == y, logits, 0.0), axis=1)   # == logits[:, y]
        f = jnp.maximum(max_all - target_val, jnp.float32(-kappa))   # clamp(min=-kappa), (B,)

        # Only the p == 0 slice contributes c*f; the wrapper sums the p partials,
        # giving  sum_p(partial_norm_p) + c*f  ==  ||box(w)-x_orig||^2 + c*f.
        scale = jnp.where(p == 0, jnp.float32(c), jnp.float32(0.0))
        row = partial_norm + scale * f                               # (B,)
        out_ref[...] = jnp.broadcast_to(row[None, :], out_ref.shape)


def cwl2_loss(w, y, x_orig, logits, box_transform, c=0.5, kappa=0.0,
              num_parallel=2, lanes=512, max_tile_rows=512):
    """Pallas equivalent of CWL2_Loss.forward. Returns shape (B,) float32."""
    assert w.shape == x_orig.shape
    B = logits.shape[0]
    n = int(w.size)

    # Lane-dense slab layout for the two big streams (rows multiple of 8,
    # last dim multiple of 128).  Per-stream tiles are <= ~1 MiB f32.
    rows = _cdiv(n, lanes)
    tile_rows = min(max_tile_rows, _round_up(_cdiv(rows, num_parallel), 8))
    rows_pad = _round_up(rows, num_parallel * tile_rows)
    num_tiles = rows_pad // (num_parallel * tile_rows)
    n_pad = rows_pad * lanes

    w_flat = w.reshape(-1)
    x_flat = x_orig.reshape(-1)
    if n_pad > n:
        w_flat = jnp.pad(w_flat, (0, n_pad - n))
        x_flat = jnp.pad(x_flat, (0, n_pad - n))
    w2 = w_flat.reshape(rows_pad, lanes)          # native dtype: bf16 streams at half the bytes
    x2 = x_flat.reshape(rows_pad, lanes)

    y_arr = jnp.asarray(y, dtype=jnp.int32).reshape(1)

    kernel = functools.partial(
        _cwl2_kernel, box_transform=box_transform, c=float(c), kappa=float(kappa),
        n_valid=n, num_tiles=num_tiles, tile_rows=tile_rows, lanes=lanes)

    stream_spec = pl.BlockSpec((tile_rows, lanes),
                               lambda p, k, y: (p * num_tiles + k, 0))
    # NOTE: if a v7x profile still shows exposed DMA per step, bump these two
    # specs to pipeline_mode=pl.Buffered(3); default double-buffering is used here.

    out = pl.pallas_call(
        kernel,
        out_shape=jax.ShapeDtypeStruct((num_parallel * 8, B), jnp.float32),
        grid_spec=pltpu.PrefetchScalarGridSpec(
            num_scalar_prefetch=1,                      # y lands in SMEM
            grid=(num_parallel, num_tiles),
            in_specs=[
                stream_spec,                            # w slab (pipelined)
                stream_spec,                            # x_orig slab (pipelined)
                pl.BlockSpec(logits.shape, lambda p, k, y: (0, 0)),  # resident
            ],
            out_specs=pl.BlockSpec((8, B), lambda p, k, y: (p, 0)),
            scratch_shapes=[pltpu.VMEM((tile_rows, lanes), jnp.float32)],
        ),
        compiler_params=pltpu.CompilerParams(
            dimension_semantics=("parallel", "arbitrary"),
            vmem_limit_bytes=32 * 1024 * 1024),
    )(y_arr, w2, x2, logits)

    parts = out.reshape(num_parallel, 8, B)[:, 0, :]    # (num_parallel, B) partials
    return parts.sum(axis=0)                            # (B,)


if __name__ == "__main__":
    key = jax.random.PRNGKey(0)
    k1, k2, k3 = jax.random.split(key, 3)

    B, C, H, W = 2, 4, 16, 16
    num_classes = 10
    y = 3
    c, kappa = 0.5, 0.0

    # w: pre-tanh reparameterized variable; x_orig: original image in [0, 1]
    w = jax.random.normal(k1, (B, C, H, W), dtype=jnp.float32)
    x_orig = jax.random.uniform(k2, (B, C, H, W), dtype=jnp.float32)
    logits = jax.random.normal(k3, (B, num_classes), dtype=jnp.float32)

    # standard C&W box transform: maps R -> [0, 1]
    box_transform = lambda v: 0.5 * (jnp.tanh(v) + 1.0)

    out = cwl2_loss(w, y, x_orig, logits, box_transform, c=c, kappa=kappa)
    out = jax.block_until_ready(out)

    # plain-JAX reference (same semantics as the PyTorch module, incl. the
    # all-ones uint8-mask "global max" behavior)
    x_ref = box_transform(w)
    norm_ref = jnp.sum((x_ref - x_orig) ** 2)
    f_ref = jnp.maximum(jnp.max(logits) - logits[:, y], -kappa)
    ref = norm_ref + c * f_ref

    assert out.shape == (B,)
    assert jnp.allclose(out, ref, rtol=1e-4, atol=1e-4), (out, ref)
    print("KERNEL_OK")
</pallas_src>

<mosaic_0001>
module attributes {stable_mosaic.version = 11 : i64} {
  func.func @_cwl2_kernel(%arg0: i32, %arg1: i32, %arg2: memref<1xi32, #tpu.memory_space<smem>>, %arg3: memref<8x512xf32, #tpu.memory_space<vmem>>, %arg4: memref<8x512xf32, #tpu.memory_space<vmem>>, %arg5: memref<2x10xf32, #tpu.memory_space<vmem>>, %arg6: memref<8x2xf32, #tpu.memory_space<vmem>>, %arg7: memref<8x512xf32, #tpu.memory_space<vmem>>) attributes {dimension_semantics = [#tpu.dimension_semantics<parallel>, #tpu.dimension_semantics<arbitrary>], iteration_bounds = array<i64: 2, 1>, scalar_prefetch = 1 : i64, scratch_operands = 1 : i64, tpu.core_type = #tpu.core_type<tc>, window_params = [{transform_indices = @transform_0, window_bounds = array<i64: 8, 512>}, {transform_indices = @transform_1, window_bounds = array<i64: 8, 512>}, {pipeline_mode = #tpu.pipeline_mode<synchronous>, transform_indices = @transform_2, window_bounds = array<i64: 2, 10>}, {transform_indices = @transform_3, window_bounds = array<i64: 8, 2>}]} {
    %c0_i32 = arith.constant 0 : i32
    %0 = arith.cmpi eq, %arg1, %c0_i32 : i32
    %1 = arith.extui %0 : i1 to i32
    %c0_i32_0 = arith.constant 0 : i32
    %2 = arith.cmpi ne, %1, %c0_i32_0 : i32
    scf.if %2 {
      %cst_12 = arith.constant 0.000000e+00 : f32
      %32 = vector.broadcast %cst_12 : f32 to vector<8x512xf32>
      %c0_13 = arith.constant 0 : index
      %c0_14 = arith.constant 0 : index
      %33 = vector.load %arg7[%c0_13, %c0_14] : memref<8x512xf32, #tpu.memory_space<vmem>>, vector<8x512xf32>
      tpu.vector_store %arg7[%c0_13, %c0_14], %32 {strides = array<i32>} : memref<8x512xf32, #tpu.memory_space<vmem>>, vector<8x512xf32>,
    } else {
    }
    %c0 = arith.constant 0 : index
    %c0_1 = arith.constant 0 : index
    %3 = vector.load %arg3[%c0, %c0_1] : memref<8x512xf32, #tpu.memory_space<vmem>>, vector<8x512xf32>
    %c0_2 = arith.constant 0 : index
    %c0_3 = arith.constant 0 : index
    %4 = vector.load %arg4[%c0_2, %c0_3] : memref<8x512xf32, #tpu.memory_space<vmem>>, vector<8x512xf32>
    %5 = math.tanh %3 : vector<8x512xf32>
    %cst = arith.constant 1.000000e+00 : f32
    %6 = vector.broadcast %cst : f32 to vector<8x512xf32>
    %7 = arith.addf %5, %6 : vector<8x512xf32>
    %cst_4 = arith.constant 5.000000e-01 : f32
    %8 = vector.broadcast %cst_4 : f32 to vector<8x512xf32>
    %9 = arith.mulf %8, %7 : vector<8x512xf32>
    %10 = arith.subf %9, %4 : vector<8x512xf32>
    %c1_i32 = arith.constant 1 : i32
    %11 = arith.muli %arg0, %c1_i32 : i32
    %12 = arith.addi %11, %arg1 : i32
    %c8_i32 = arith.constant 8 : i32
    %13 = arith.muli %12, %c8_i32 : i32
    %14 = tpu.iota {dimensions = array<i32: 0>} : vector<8x512xi32>
    %15 = tpu.iota {dimensions = array<i32: 1>} : vector<8x512xi32>
    %16 = vector.broadcast %13 : i32 to vector<8x512xi32>
    %17 = arith.addi %16, %14 : vector<8x512xi32>
    %c512_i32 = arith.constant 512 : i32
    %18 = vector.broadcast %c512_i32 : i32 to vector<8x512xi32>
    %19 = arith.muli %17, %18 : vector<8x512xi32>
    %20 = arith.addi %19, %15 : vector<8x512xi32>
    %c2048_i32 = arith.constant 2048 : i32
    %21 = vector.broadcast %c2048_i32 : i32 to vector<8x512xi32>
    %22 = arith.cmpi slt, %20, %21 : vector<8x512xi32>
    %cst_5 = arith.constant 0.000000e+00 : f32
    %23 = vector.broadcast %cst_5 : f32 to vector<8x512xf32>
    %24 = arith.select %22, %10, %23 : vector<8x512xi1>, vector<8x512xf32>
    %c0_6 = arith.constant 0 : index
    %c0_7 = arith.constant 0 : index
    %25 = vector.load %arg7[%c0_6, %c0_7] : memref<8x512xf32, #tpu.memory_space<vmem>>, vector<8x512xf32>
    %26 = arith.mulf %24, %24 : vector<8x512xf32>
    %27 = arith.addf %25, %26 : vector<8x512xf32>
    %c0_8 = arith.constant 0 : index
    %c0_9 = arith.constant 0 : index
    %28 = vector.load %arg7[%c0_8, %c0_9] : memref<8x512xf32, #tpu.memory_space<vmem>>, vector<8x512xf32>
    tpu.vector_store %arg7[%c0_8, %c0_9], %27 {strides = array<i32>} : memref<8x512xf32, #tpu.memory_space<vmem>>, vector<8x512xf32>,
    %c0_i32_10 = arith.constant 0 : i32
    %29 = arith.cmpi eq, %arg1, %c0_i32_10 : i32
    %30 = arith.extui %29 : i1 to i32
    %c0_i32_11 = arith.constant 0 : i32
    %31 = arith.cmpi ne, %30, %c0_i32_11 : i32
    scf.if %31 {
      %c0_12 = arith.constant 0 : index
      %c0_13 = arith.constant 0 : index
      %32 = vector.load %arg7[%c0_12, %c0_13] : memref<8x512xf32, #tpu.memory_space<vmem>>, vector<8x512xf32>
      %33 = vector.shape_cast %32 : vector<8x512xf32> to vector<1x8x512xf32>
      %cst_14 = arith.constant dense<0.000000e+00> : vector<1xf32>
      %34 = vector.multi_reduction <add>, %33, %cst_14 [1, 2] : vector<1x8x512xf32> to vector<1xf32>
      %35 = vector.shape_cast %34 : vector<1xf32> to vector<1x1x1xf32>
      %36 = vector.extract %35[0, 0, 0] : f32 from vector<1x1x1xf32>
      %c0_15 = arith.constant 0 : index
      %c0_16 = arith.constant 0 : index
      %37 = vector.load %arg5[%c0_15, %c0_16] : memref<2x10xf32, #tpu.memory_space<vmem>>, vector<2x10xf32>
      %38 = vector.shape_cast %37 : vector<2x10xf32> to vector<1x2x10xf32>
      %cst_17 = arith.constant dense<0xFF800000> : vector<1xf32>
      %39 = vector.multi_reduction <maximumf>, %38, %cst_17 [1, 2] : vector<1x2x10xf32> to vector<1xf32>
      %40 = vector.shape_cast %39 : vector<1xf32> to vector<1x1x1xf32>
      %41 = vector.extract %40[0, 0, 0] : f32 from vector<1x1x1xf32>
      %c0_18 = arith.constant 0 : index
      %42 = memref.load %arg2[%c0_18] : memref<1xi32, #tpu.memory_space<smem>>
      %43 = tpu.iota {dimensions = array<i32: 1>} : vector<2x10xi32>
      %44 = vector.broadcast %42 : i32 to vector<2x10xi32>
      %45 = arith.cmpi eq, %43, %44 : vector<2x10xi32>
      %cst_19 = arith.constant 0.000000e+00 : f32
      %46 = vector.broadcast %cst_19 : f32 to vector<2x10xf32>
      %47 = arith.select %45, %37, %46 : vector<2x10xi1>, vector<2x10xf32>
      %cst_20 = arith.constant dense<0.000000e+00> : vector<2xf32>
      %48 = vector.multi_reduction <add>, %47, %cst_20 [1] : vector<2x10xf32> to vector<2xf32>
      %49 = vector.broadcast %41 : f32 to vector<2xf32>
      %50 = arith.subf %49, %48 : vector<2xf32>
      %cst_21 = arith.constant -0.000000e+00 : f32
      %51 = vector.broadcast %cst_21 : f32 to vector<2xf32>
      %52 = arith.maximumf %50, %51 : vector<2xf32>
      %c0_i32_22 = arith.constant 0 : i32
      %53 = arith.cmpi eq, %arg0, %c0_i32_22 : i32
      %cst_23 = arith.constant 5.000000e-01 : f32
      %cst_24 = arith.constant 0.000000e+00 : f32
      %54 = arith.select %53, %cst_23, %cst_24 : f32
      %55 = vector.broadcast %54 : f32 to vector<2xf32>
      %56 = arith.mulf %55, %52 : vector<2xf32>
      %57 = vector.broadcast %36 : f32 to vector<2xf32>
      %58 = arith.addf %57, %56 : vector<2xf32>
      %59 = vector.shape_cast %58 : vector<2xf32> to vector<1x2xf32>
      %60 = vector.shape_cast %59 : vector<1x2xf32> to vector<1x2xf32>
      %61 = vector.broadcast %60 : vector<1x2xf32> to vector<8x2xf32>
      %c0_25 = arith.constant 0 : index
      %c0_26 = arith.constant 0 : index
      %62 = vector.load %arg6[%c0_25, %c0_26] : memref<8x2xf32, #tpu.memory_space<vmem>>, vector<8x2xf32>
      tpu.vector_store %arg6[%c0_25, %c0_26], %61 {strides = array<i32>} : memref<8x2xf32, #tpu.memory_space<vmem>>, vector<8x2xf32>,
    } else {
    }
    return
  }
  func.func @transform_0(%arg0: i32, %arg1: i32, %arg2: memref<1xi32, #tpu.memory_space<smem>>) -> (i32, i32) {
    %c1_i32 = arith.constant 1 : i32
    %0 = arith.muli %arg0, %c1_i32 : i32
    %1 = arith.addi %0, %arg1 : i32
    %c0_i32 = arith.constant 0 : i32
    %c0_i32_0 = arith.constant 0 : i32
    return %1, %c0_i32 : i32, i32
  }
  func.func @transform_1(%arg0: i32, %arg1: i32, %arg2: memref<1xi32, #tpu.memory_space<smem>>) -> (i32, i32) {
    %c1_i32 = arith.constant 1 : i32
    %0 = arith.muli %arg0, %c1_i32 : i32
    %1 = arith.addi %0, %arg1 : i32
    %c0_i32 = arith.constant 0 : i32
    %c0_i32_0 = arith.constant 0 : i32
    return %1, %c0_i32 : i32, i32
  }
  func.func @transform_2(%arg0: i32, %arg1: i32, %arg2: memref<1xi32, #tpu.memory_space<smem>>) -> (i32, i32) {
    %c0_i32 = arith.constant 0 : i32
    %c0_i32_0 = arith.constant 0 : i32
    %c0_i32_1 = arith.constant 0 : i32
    return %c0_i32, %c0_i32_0 : i32, i32
  }
  func.func @transform_3(%arg0: i32, %arg1: i32, %arg2: memref<1xi32, #tpu.memory_space<smem>>) -> (i32, i32) {
    %c0_i32 = arith.constant 0 : i32
    %c0_i32_0 = arith.constant 0 : i32
    return %arg0, %c0_i32 : i32, i32
  }
}

</mosaic_0001>

<bundles_post_ra>
// kernel: tpu_custom_call.1
= control target key start
LH: loop header
LB: loop body
LE: loop exit
PB: predicated region body
PF: predicated region fallthrough
CT: control target
= control target key end

     0   :  { %s918_s0 = inlined_call_operand.<no memory space> [shape: s32[1], index: 0, kind: input, shape index: {}]   ;;  %s919_s1 = inlined_call_operand.hbm [shape: f32[16,512], index: 1, kind: input, shape index: {}]   ;;  %s920_s2 = inlined_call_operand.hbm [shape: f32[16,512], index: 2, kind: input, shape index: {}]   ;;  %s921_s3 = inlined_call_operand.vmem [shape: f32[2,10], index: 3, kind: input, shape index: {}]   ;;  %s922_s4 = inlined_call_operand.vmem [shape: f32[16,2], index: 4, kind: output, shape index: {}]  }
   0x1   :  { %9 = sst [smem:[#allocation4]] %s918_s0 }
   0x2   :  { %10 = vsyncpa [#allocation6], 0 }
   0x3   :  { %12 = vsyncpa [#allocation6 + $0x1], 0 }
   0x4   :  { %13 = vsyncpa [#allocation8], 0 }
   0x5   :  { %15 = vsyncpa [#allocation8 + $0x1], 0  ;;  %s721_s17 = smov 0   ;;  %s723_s18 = smov 0  }
   0x6   :  { %s725_s19 = smov 0   ;;  %s727_s20 = smov 0  }
   0x7   :  { %s729_s21 = smov 0   ;;  %s731_s22 = smov 0  }
   0x8 LB: > { %s484_s0 = sadd.s32 4294967295, %s689_s22   ;;  %s33_s23 = sadd.s32 1, %s685_s21  ;;  %s689_s22 = sphi %s731_s22, %s21_s22   ;;  %s685_s21 = sphi %s729_s21, %s936_s21   ;;  %s681_s20 = sphi %s727_s20, %s935_s20   ;;  %s677_s19 = sphi %s725_s19, %s934_s19   ;;  %s673_s18 = sphi %s723_s18, %s933_s18   ;;  %s669_s17 = sphi %s721_s17, %s932_s17  }
   0x9   : > { %p35_p0 = scmp.ge.s32.totalorder %s33_s23, 2  ;;  %s42_s24 = sadd.s32 1, %s677_s19 }
   0xa   : > { %p49_p1 = scmp.ne.s32.totalorder %s677_s19, %s673_s18  ;;  %p50_p2 = scmp.eq.s32.totalorder %s689_s22, 0 }
   0xb   : > { %s938_s23 = smov (%p35_p0, %s33_s23), 0  ;;  %p55_p4 = scmp.ne.s32.totalorder %s673_s18, %s669_s17 }
   0xc   : > { %p757_p3 = por %p50_p2, %p49_p1  ;;  %s39_s26 = ssub.s32 %s685_s21, %s938_s23 }
   0xd   : > { %p56_p5 = scmp.eq.s32.totalorder %s484_s0, 0  ;;  %p40_p6 = scmp.eq.s32.totalorder %s39_s26, 0 }
   0xe   : > { %p518_p8 = scmp.lt.s32.totalorder %s689_s22, 2  ;;  %s773_s29 = sand.u32 1, %s677_s19  }
   0xf   : > { %p764_p7 = por %p56_p5, %p55_p4  ;;  %s501_s30 = sshll.u32 %s685_s21, 9 }
  0x10   : > { %s770_s28 = scalar_select %p40_p6, %s677_s19, %s42_s24  }
  0x11   : > { %s925_s27 = scalar_select %p764_p7, 1, 0 }
  0x12   : > { %s488_s5 = sshll.u32 %s773_s29, 5  ;;  %s782_s8 = scalar_lea.hbm %s919_s1, %s501_s30 }
  0x13   : > { %s161_s9 = scalar_lea.vmem [#allocation5], %s488_s5  ;;  %p788_p9 = pnand %p518_p8, %p757_p3 }
  0x14   : > { %s170_s10 = sshll.u32 %s161_s9, 4  ;;  %s158_s12 = scalar_lea.sflag [#allocation6], %s773_s29  ;;  %s792_s10 = int_to_ptr.vmem [resolvable:$true] %s170_s10 }
  0x15   : > { %s575_s13 = scalar_lea.hbm %s782_s8, 512  ;;  %p577_p13 = pneg %p788_p9 }
  0x16   : > { %p576_p12 = scmp.ne.s32.totalorder %s782_s8, %s575_s13  ;;  %s580_s16 = scalar_lea.hbm %s919_s1, 1024 }
  0x17   : > { %p581_p2 = scmp.lt.u32.totalorder %s782_s8, %s919_s1  ;;  %p582_p3 = scmp.lt.u32.totalorder %s580_s16, %s575_s13 }
  0x18   : > { %p578_p0 = pnand %p577_p13, %p576_p12  ;;  %p584_p5 = scmp.lt.u32.totalorder %s575_s13, %s782_s8 }
  0x19   : > { %p583_p4 = por %p582_p3, %p581_p2 }
  0x1a   : > { %p579_p1 = pneg %p578_p0 }
  0x1b   : > { %p585_p6 = por %p584_p5, %p583_p4 }
  0x1d   : > { %p586_p8 = pnand %p585_p6, %p579_p1 }
  0x1f   : > { %589 = shalt.err (!%p586_p8)
}
  0x20   : > { %s590_s24 = scalar_lea.vmem %s792_s10, 512  ;;  %s691_s25 = smov [#allocation5]  }
  0x21   : > { %p591_p12 = scmp.ne.s32.totalorder %s792_s10, %s590_s24  ;;  %s595_s26 = sshll.u32 %s691_s25, 4  ;;  %s596_s26 = int_to_ptr.vmem [resolvable:$false] %s595_s26 }
  0x22   : > { %s597_s6 = scalar_lea.vmem %s596_s26, 1024  ;;  %p598_p11 = scmp.lt.s32.totalorder %s792_s10, %s596_s26 }
  0x23   : > { %p593_p0 = pnand %p591_p12, %p577_p13  ;;  %p599_p2 = scmp.lt.s32.totalorder %s597_s6, %s590_s24 }
  0x25   : > { %p594_p10 = pneg %p593_p0  ;;  %p600_p3 = por %p599_p2, %p598_p11 }
  0x27   : > { %p601_p4 = pnand %p600_p3, %p594_p10 }
  0x29   : > { %604 = shalt.err (!%p601_p4)
}
  0x2a   : > { %514 = dma.hbm_to_vmem [thread:$0]  (!%p788_p9), %s782_s8, 512, %s792_s10, %s158_s12  }
  0x2b   : > { %p927_p1 = scmp.lt.s32.totalorder %s689_s22, 3  ;;  %p928_p5 = scmp.ge.s32.totalorder %s689_s22, 1 }
  0x2c   : > { %s835_s14 = scalar_lea.hbm %s920_s2, %s501_s30  ;;  %s181_s15 = scalar_lea.vmem [#allocation7], %s488_s5 }
  0x2d   : > { %p826_p6 = pnand %p928_p5, %p927_p1  ;;  %s190_s16 = sshll.u32 %s181_s15, 4  ;;  %s191_s16 = int_to_ptr.vmem [resolvable:$true] %s190_s16 }
  0x2e   : > { %s178_s8 = scalar_lea.sflag [#allocation8], %s773_s29  ;;  %s605_s10 = scalar_lea.hbm %s835_s14, 512 }
  0x2f   : > { %s929_s7 = scalar_select %p826_p6, 1, 0 }
  0x30   : > { %p606_p10 = scmp.ne.s32.totalorder %s835_s14, %s605_s10  ;;  %s610_s30 = scalar_lea.hbm %s920_s2, 1024 }
  0x31   : > { %p611_p12 = scmp.lt.u32.totalorder %s835_s14, %s920_s2  ;;  %p612_p0 = scmp.lt.u32.totalorder %s610_s30, %s605_s10 }
  0x32   : > { %p608_p11 = pnand %p606_p10, %p577_p13  ;;  %p614_p3 = scmp.lt.u32.totalorder %s605_s10, %s835_s14 }
  0x33   : > { %p613_p2 = por %p612_p0, %p611_p12 }
  0x34   : > { %p609_p8 = pneg %p608_p11 }
  0x35   : > { %p615_p4 = por %p614_p3, %p613_p2 }
  0x37   : > { %p616_p1 = pnand %p615_p4, %p609_p8 }
  0x39   : > { %619 = shalt.err (!%p616_p1)
}
  0x3a   : > { %s620_s29 = scalar_lea.vmem %s191_s16, 512  ;;  %s692_s5 = smov [#allocation7]  }
  0x3b   : > { %p621_p5 = scmp.ne.s32.totalorder %s191_s16, %s620_s29  ;;  %s625_s25 = sshll.u32 %s692_s5, 4  ;;  %s626_s25 = int_to_ptr.vmem [resolvable:$false] %s625_s25 }
  0x3c   : > { %s627_s26 = scalar_lea.vmem %s626_s25, 1024  ;;  %p628_p7 = scmp.lt.s32.totalorder %s191_s16, %s626_s25 }
  0x3d   : > { %p623_p10 = pnand %p621_p5, %p577_p13  ;;  %p629_p6 = scmp.lt.s32.totalorder %s627_s26, %s620_s29 }
  0x3f   : > { %p624_p11 = pneg %p623_p10  ;;  %p630_p0 = por %p629_p6, %p628_p7 }
  0x41   : > { %p631_p12 = pnand %p630_p0, %p624_p11 }
  0x43   : > { %634 = shalt.err (!%p631_p12)
}
  0x44   : > { %517 = dma.hbm_to_vmem [thread:$0]  (!%p788_p9), %s835_s14, 512, %s191_s16, %s178_s8  }
  0x45   : > { %p930_p8 = scmp.ne.s32.totalorder %s929_s7, 0 }
  0x46   : > { %s201_s6 = sand.u32 (!%p930_p8), 1, %s673_s18   ;;  %p931_p13 = scmp.ne.s32.totalorder (!%p930_p8), %s925_s27, 0 }
  0x47   : > { %199 = sbr.rel (%p930_p8) target bundleno = 329 (0x149), region = 32  ;;  %s495_s9 = sshll.u32 (!%p930_p8), %s201_s6, 5 }
  0x48   : > { %s202_s13 = scalar_lea.sflag (!%p930_p8), [#allocation6], %s201_s6  ;;  %s205_s15 = scalar_lea.vmem (!%p930_p8), [#allocation5], %s495_s9 }
  0x4e   : > { %660 = dma.done.wait (%p931_p13), %s202_s13, 512  }
  0x4f   : > { %662 = vsyncadd (%p931_p13), %s202_s13, 4294966784  ;;  %s211_s10 = scalar_lea.sflag [#allocation8], %s201_s6  ;;  %s866_s12 = scalar_lea.vmem [#allocation7], %s495_s9 }
  0x50   : > { %664 = dma.done.wait (%p931_p13), %s211_s10, 512  }
  0x51   : > { %666 = vsyncadd (%p931_p13), %s211_s10, 4294966784  ;;  %s350_s11 = sld [smem:[#allocation4]]  ;;  %v281_v0 = vlaneseq  ;;  %s498_s7 = sshll.u32 %s681_s20, 3  ;;  %v255_v3 = vld [vmem:[%s205_s15] sm:$0xff]  ;;  %v256_v4 = vld [vmem:[%s205_s15 + $0x8] sm:$0xff]  ;;  %vm339_vm1 = vcmask 74752  }
  0x52   : > { %v288_v2 = vstv %s498_s7  ;;  %v257_v5 = vld [vmem:[%s205_s15 + $0x10] sm:$0xff]  ;;  %v258_v8 = vld [vmem:[%s205_s15 + $0x18] sm:$0xff]  ;;  %567 = vtanh.f32 %v255_v3  ;;  %v338_v10 = vld [vmem:[%s921_s3] sm:$0x3]  ;;  %p360_p7 = scmp.eq.s32.totalorder %s681_s20, 0  ;;  %p243_p9 = scmp.lt.s32.totalorder %s681_s20, 1 }
  0x53   : > { %v873_v1 = vshrl.u32 %v281_v0, 7  ;;  %v875_v6 = vand.u32 127, %v281_v0  ;;  %569 = vtanh.f32 %v256_v4  ;;  %v259_v23 = vld [vmem:[%s866_s12] sm:$0xff]  ;;  %v260_v27 = vld [vmem:[%s866_s12 + $0x8] sm:$0xff]  ;;  %v261_v31 = vld [vmem:[%s866_s12 + $0x10] sm:$0xff]  ;;  %v340_v52 = vsel %vm339_vm1, %v338_v10, -inf }
  0x54   : > { %571 = vtanh.f32 %v257_v5  ;;  %v262_v34 = vld [vmem:[%s866_s12 + $0x18] sm:$0xff]  ;;  %s361_s16 = scalar_select %p360_p7, 0.5, 0.0  ;;  %vm384_vm6 = vcmask 15360  }
  0x55   : > { %v289_v9 = vadd.s32 %v288_v2, %v873_v1  ;;  %573 = vtanh.f32 %v258_v8  ;;  %v285_v14 = vadd.s32 128, %v875_v6  ;;  %v286_v15 = vadd.s32 256, %v875_v6  ;;  %s940_s20 = smov (!%p243_p9, %s681_s20), 1 }
  0x56   : > { %v287_v16 = vadd.s32 384, %v875_v6  ;;  %v362_v8 = vstv %s361_s16  ;;  %s497_s30 = sshll.u32 %s940_s20, 3 }
  0x57   : > { %v351_v7 = vstv %s350_s11  ;;  %v290_v13 = vmul.u32 512, %v289_v9  ;;  %s246_s29 = scalar_lea.vmem %s922_s4, %s497_s30 }
  0x58   : > { %vm352_vm0 = vcmp.eq.s32.totalorder %v875_v6, %v351_v7 }
  0x59   : > { %v353_v11 = vsel %vm352_vm0, %v338_v10, 0.0  ;;  %v291_v18 = vadd.s32 %v290_v13, %v875_v6  ;;  %v292_v21 = vadd.s32 %v290_v13, %v285_v14  ;;  %v293_v25 = vadd.s32 %v290_v13, %v286_v15 }
  0x5a   : > { %v354_v12 = vsel %vm339_vm1, %v353_v11, 0.0  ;;  %v294_v30 = vadd.s32 %v290_v13, %v287_v16  ;;  %v369_v10 = vsub.s32 %v875_v6, %v873_v1 }
  0x5b   : > { %355 = vadd.xlane.f32.xlu1 %v354_v12  ;;  %vm295_vm2 = vcmp.lt.s32.totalorder %v291_v18, 2048  ;;  %vm296_vm3 = vcmp.lt.s32.totalorder %v292_v21, 2048  ;;  %vm297_vm4 = vcmp.lt.s32.totalorder %v293_v25, 2048 }
  0x5c   : > { %v568_v17 = vpop.eup %567  ;;  %vm298_vm5 = vcmp.lt.s32.totalorder %v294_v30, 2048 }
  0x5d   : > { %v570_v19 = vpop.eup %569  ;;  %v267_v20 = vadd.f32 1.0, %v568_v17 }
  0x5e   : > { %v572_v22 = vpop.eup %571  ;;  %v268_v24 = vadd.f32 1.0, %v570_v19 }
  0x5f   : > { %v574_v26 = vpop.eup %573  ;;  %v269_v28 = vadd.f32 1.0, %v572_v22  ;;  %v271_v29 = vmul.f32 0.5, %v267_v20 }
  0x60   : > { %v270_v32 = vadd.f32 1.0, %v574_v26  ;;  %v272_v33 = vmul.f32 0.5, %v268_v24 }
  0x61   : > { %v273_v35 = vmul.f32 0.5, %v269_v28  ;;  %v275_v36 = vsub.f32 %v271_v29, %v259_v23 }
  0x62   : > { %v274_v37 = vmul.f32 0.5, %v270_v32  ;;  %v276_v38 = vsub.f32 %v272_v33, %v260_v27 }
  0x63   : > { %v277_v39 = vsub.f32 %v273_v35, %v261_v31  ;;  %v299_v40 = vsel %vm295_vm2, %v275_v36, 0.0 }
  0x64   : > { %v278_v41 = vsub.f32 %v274_v37, %v262_v34  ;;  %v300_v42 = vsel %vm296_vm3, %v276_v38, 0.0  ;;  %v307_v43 = vmul.f32 %v299_v40, %v299_v40 }
  0x65   : > { %v301_v44 = vsel %vm297_vm4, %v277_v39, 0.0  ;;  %v308_v45 = vmul.f32 %v300_v42, %v300_v42 }
  0x66   : > { %v302_v46 = vsel %vm298_vm5, %v278_v41, 0.0  ;;  %v309_v47 = vmul.f32 %v301_v44, %v301_v44 }
  0x67   : > { %v310_v48 = vmul.f32 %v302_v46, %v302_v46  ;;  %v326_v49 = vadd.f32 %v308_v45, %v307_v43 }
  0x69   : > { %v327_v50 = vadd.f32 %v326_v49, %v309_v47 }
  0x6b   : > { %v328_v51 = vadd.f32 %v327_v50, %v310_v48 }
  0x6d   : > { %329 = vadd.xlane.f32.xlu0 %v328_v51 }
  0x71   : > { %341 = vmax.xlane.f32.xlu0 %v340_v52 }
  0xe8   : > { %v356_v4 = vpop.xlane.xlu1 %355 }
  0xfa   : > { %v330_v53 = vpop.xlane.xlu0 %329 }
  0xfb   : > { %v331_v54 = vrot.slane %v330_v53, 4 }
  0xfd   : > { %v332_v55 = vadd.f32 %v331_v54, %v330_v53 }
  0xfe   : > { %v342_v56 = vpop.xlane.xlu0 %341 }
  0xff   : > { %v333_v57 = vrot.slane %v332_v55, 2  ;;  %v343_v58 = vrot.slane %v342_v56, 4 }
 0x101   : > { %v344_v59 = vmax.f32 %v342_v56, %v343_v58  ;;  %v334_v60 = vadd.f32 %v333_v57, %v332_v55 }
 0x103   : > { %v345_v61 = vrot.slane %v344_v59, 2  ;;  %v335_v62 = vrot.slane %v334_v60, 1 }
 0x105   : > { %v346_v63 = vmax.f32 %v344_v59, %v345_v61  ;;  %v336_v0 = vadd.f32 %v335_v62, %v334_v60 }
 0x107   : > { %503 = vpush %v336_v0  ;;  %v347_v2 = vrot.slane %v346_v63, 1 }
 0x109   : > { %v348_v3 = vmax.f32 %v346_v63, %v347_v2 }
 0x10b   : > { %505 = vpush %v348_v3 }
 0x138   : > { %s504_s8 = spop %503 }
 0x139   : > { %v364_v12 = vstv %s504_s8 }
 0x13c   : > { %s506_s17 = spop %505 }
 0x13d   : > { %v357_v5 = vstv %s506_s17 }
 0x13e   : > { %v358_v7 = vsub.f32 %v357_v5, %v356_v4 }
 0x140   : > { %v359_v9 = vmax.f32 %v358_v7, -0.0 }
 0x142   : > { %v363_v11 = vmul.f32 %v362_v8, %v359_v9 }
 0x144   : > { %v365_v13 = vadd.f32 %v364_v12, %v363_v11 }
 0x146   : > { %v370_v14 = vrot.slane %v365_v13, %v369_v10 }
 0x148   : > { %385 = vst.msk [vmem:[%s246_s29] sm:$0xff] %vm384_vm6, %v370_v14 }
 0x149 PF: > { %s21_s22 = sadd.s32 1, %s689_s22   ;;  %s932_s17 = smov %s673_s18 }
 0x14a   : > { %p18_p6 = scmp.ge.s32.totalorder %s21_s22, 4   ;;  %s933_s18 = smov %s677_s19 }
 0x14b   : > { %s934_s19 = smov %s770_s28  ;;  %s935_s20 = smov %s685_s21 }
 0x14c   : > { %s936_s21 = smov %s938_s23  ;;  %20 = sbr.rel (!%p18_p6) target bundleno = 8 (0x8), region = 93 }
 0x153   :  { %405 = vsyncpa [#allocation6], 1 }
 0x154   :  { %407 = vsyncpa [#allocation6 + $0x1], 1 }
 0x155   :  { %408 = vsyncpa [#allocation8], 1 }
 0x156   :  { %410 = vsyncpa [#allocation8 + $0x1], 1 }

</bundles_post_ra>
